<compile_context>
chip_gen: v6e
topology: v6e:2x2x1
jax: 0.10.0
libtpu: 0.0.40
codegen_flags: <defaults>
</compile_context>

<pallas_src>
import functools

import jax
import jax.numpy as jnp
from jax.experimental import pallas as pl
from jax.experimental.pallas import tpu as pltpu


def _gemm_relu_kernel(w_ref, p_ref, o_ref, *, relu):
    """o = [relu](W @ P) for one lane-dense M tile.

    w_ref: (Cout_p, K_p)   reshaped OIHW conv weights (VMEM-resident, tiny)
    p_ref: (K_p, TM)       im2col patch tile, flattened batch*spatial on lanes
    o_ref: (Cout_p, TM)    lane-dense output tile
    """
    acc = jnp.dot(w_ref[...], p_ref[...], preferred_element_type=jnp.float32)
    if relu:
        acc = jnp.maximum(acc, 0.0)
    o_ref[...] = acc.astype(o_ref.dtype)


def _round_up(v, m):
    return ((v + m - 1) // m) * m


def basic_conv(x_nchw, w_oihw, *, padding=1, relu=True):
    """BasicConv.forward: Conv2d(bias=False, stride=1, padding=padding) [+ ReLU].

    x_nchw:  (N, Cin, H, W)      float32
    w_oihw:  (Cout, Cin, KH, KW) float32
    returns: (N, Cout, Ho, Wo)   float32
    """
    N, Cin, H, W = x_nchw.shape
    Cout, _, KH, KW = w_oihw.shape
    Ho = H + 2 * padding - KH + 1
    Wo = W + 2 * padding - KW + 1
    K = Cin * KH * KW
    M = N * Ho * Wo

    # ---- wrapper-side layout plumbing (XLA): pad + im2col -> (K, M) ----------
    xp = jnp.pad(x_nchw, ((0, 0), (0, 0), (padding, padding), (padding, padding)))
    taps = []
    for kh in range(KH):
        for kw in range(KW):
            taps.append(xp[:, :, kh:kh + Ho, kw:kw + Wo])     # (N, Cin, Ho, Wo)
    # contraction index order (cin, kh, kw) matches w_oihw.reshape(Cout, Cin*KH*KW)
    p = jnp.stack(taps, axis=2)                               # (N, Cin, KH*KW, Ho, Wo)
    p = p.reshape(N, K, Ho * Wo)
    p = jnp.transpose(p, (1, 0, 2)).reshape(K, M)             # (K, N*Ho*Wo)
    w2d = w_oihw.reshape(Cout, K)                             # (Cout, Cin*KH*KW)

    # ---- align to TPU tiles: lanes (128) for M, sublanes (8) for K / Cout ----
    LANE, SUB = 128, 8
    Mp = _round_up(M, LANE)
    Kp = _round_up(K, SUB)
    Cop = _round_up(Cout, SUB)
    if (Kp != K) or (Mp != M):
        p = jnp.pad(p, ((0, Kp - K), (0, Mp - M)))
    if (Cop != Cout) or (Kp != K):
        w2d = jnp.pad(w2d, ((0, Cop - Cout), (0, Kp - K)))

    # tile the M axis: biggest tile that still gives >=2 grid steps (megacore)
    tm = Mp
    for cand in (2048, 1024, 512, 256, 128):
        if Mp % cand == 0 and Mp // cand >= 2:
            tm = cand
            break
    grid_m = Mp // tm

    kernel = functools.partial(_gemm_relu_kernel, relu=relu)
    out2d = pl.pallas_call(
        kernel,
        out_shape=jax.ShapeDtypeStruct((Cop, Mp), jnp.float32),
        grid_spec=pltpu.PrefetchScalarGridSpec(
            num_scalar_prefetch=0,
            grid=(grid_m,),
            in_specs=[
                pl.BlockSpec((Cop, Kp), lambda m: (0, 0)),    # weights, resident
                pl.BlockSpec((Kp, tm), lambda m: (0, m)),     # patch tile
            ],
            out_specs=pl.BlockSpec((Cop, tm), lambda m: (0, m)),
        ),
        compiler_params=pltpu.CompilerParams(
            dimension_semantics=("parallel",)),
    )(w2d, p)

    out2d = out2d[:Cout, :M]                                  # drop alignment padding
    # (Cout, N*Ho*Wo) -> (N, Cout, Ho, Wo)   (wrapper-side reshuffle)
    return jnp.transpose(out2d.reshape(Cout, N, Ho, Wo), (1, 0, 2, 3))


if __name__ == "__main__":
    key = jax.random.PRNGKey(0)
    kx, kw = jax.random.split(key)

    # Shapes consistent with BasicConv(in_channels=4, out_channels=8,
    # kernel_size=3, stride=1, padding=1).
    N, Cin, H, W = 2, 4, 16, 16
    Cout, KH, KW = 8, 3, 3

    x = jax.random.normal(kx, (N, Cin, H, W), dtype=jnp.float32)
    fan_in = Cin * KH * KW
    bound = (1.0 / fan_in) ** 0.5
    w = jax.random.uniform(kw, (Cout, Cin, KH, KW), dtype=jnp.float32,
                           minval=-bound, maxval=bound)

    out = jax.block_until_ready(basic_conv(x, w, padding=1, relu=True))

    # Reference: XLA conv (same semantics as PyTorch Conv2d(bias=False)) + ReLU.
    conv_ref = jax.lax.conv_general_dilated(
        x, w, window_strides=(1, 1), padding=((1, 1), (1, 1)),
        dimension_numbers=("NCHW", "OIHW", "NCHW"))
    ref = jnp.maximum(conv_ref, 0.0)
    assert out.shape == (N, Cout, H, W)
    assert jnp.allclose(out, ref, atol=1e-5, rtol=1e-5), "mismatch vs XLA reference"

    # relu=False path (BasicConv(relu=False)): conv only, no activation.
    out_nr = jax.block_until_ready(basic_conv(x, w, padding=1, relu=False))
    assert jnp.allclose(out_nr, conv_ref, atol=1e-5, rtol=1e-5), "relu=False mismatch"

    # TODO(synk): BatchNorm2d exists in __init__ but is not applied in forward(),
    # so it is deliberately not implemented here.
    print("KERNEL_OK")
</pallas_src>

<mosaic_0001>
module attributes {stable_mosaic.version = 11 : i64} {
  func.func @_gemm_relu_kernel(%arg0: i32, %arg1: memref<8x40xf32, #tpu.memory_space<vmem>>, %arg2: memref<40x256xf32, #tpu.memory_space<vmem>>, %arg3: memref<8x256xf32, #tpu.memory_space<vmem>>) attributes {dimension_semantics = [#tpu.dimension_semantics<parallel>], iteration_bounds = array<i64: 2>, scalar_prefetch = 0 : i64, scratch_operands = 0 : i64, tpu.core_type = #tpu.core_type<tc>, window_params = [{pipeline_mode = #tpu.pipeline_mode<synchronous>, transform_indices = @transform_0, window_bounds = array<i64: 8, 40>}, {transform_indices = @transform_1, window_bounds = array<i64: 40, 256>}, {transform_indices = @transform_2, window_bounds = array<i64: 8, 256>}]} {
    %c0 = arith.constant 0 : index
    %c0_0 = arith.constant 0 : index
    %0 = vector.load %arg1[%c0, %c0_0] : memref<8x40xf32, #tpu.memory_space<vmem>>, vector<8x40xf32>
    %c0_1 = arith.constant 0 : index
    %c0_2 = arith.constant 0 : index
    %1 = vector.load %arg2[%c0_1, %c0_2] : memref<40x256xf32, #tpu.memory_space<vmem>>, vector<40x256xf32>
    %cst = arith.constant dense<0.000000e+00> : vector<8x256xf32>
    %2 = tpu.matmul %0, %1, %cst {dimension_numbers = #tpu.dot_dimension_numbers<[1], [0], [0], [1], [0, 0, 1, 1], [], []>} : vector<8x40xf32>, vector<40x256xf32>, vector<8x256xf32> -> vector<8x256xf32>
    %cst_3 = arith.constant 0.000000e+00 : f32
    %3 = vector.broadcast %cst_3 : f32 to vector<8x256xf32>
    %4 = arith.maximumf %2, %3 : vector<8x256xf32>
    %c0_4 = arith.constant 0 : index
    %c0_5 = arith.constant 0 : index
    %5 = vector.load %arg3[%c0_4, %c0_5] : memref<8x256xf32, #tpu.memory_space<vmem>>, vector<8x256xf32>
    tpu.vector_store %arg3[%c0_4, %c0_5], %4 {strides = array<i32>} : memref<8x256xf32, #tpu.memory_space<vmem>>, vector<8x256xf32>,
    return
  }
  func.func @transform_0(%arg0: i32) -> (i32, i32) {
    %c0_i32 = arith.constant 0 : i32
    %c0_i32_0 = arith.constant 0 : i32
    %c0_i32_1 = arith.constant 0 : i32
    return %c0_i32, %c0_i32_0 : i32, i32
  }
  func.func @transform_1(%arg0: i32) -> (i32, i32) {
    %c0_i32 = arith.constant 0 : i32
    %c0_i32_0 = arith.constant 0 : i32
    return %c0_i32, %arg0 : i32, i32
  }
  func.func @transform_2(%arg0: i32) -> (i32, i32) {
    %c0_i32 = arith.constant 0 : i32
    %c0_i32_0 = arith.constant 0 : i32
    return %c0_i32, %arg0 : i32, i32
  }
}

</mosaic_0001>

<bundles_post_ra>
// kernel: tpu_custom_call.1
= control target key start
LH: loop header
LB: loop body
LE: loop exit
PB: predicated region body
PF: predicated region fallthrough
CT: control target
= control target key end

     0   :  { %7 = vsyncpa [#allocation3], 0  ;;  %s758_s0 = inlined_call_operand.hbm [shape: f32[8,40], index: 0, kind: input, shape index: {}]   ;;  %s759_s1 = inlined_call_operand.hbm [shape: f32[40,512], index: 1, kind: input, shape index: {}]   ;;  %s760_s2 = inlined_call_operand.hbm [shape: f32[8,512], index: 2, kind: output, shape index: {}]  }
   0x1   :  { %8 = vsyncpa [#allocation6], 0 }
   0x2   :  { %10 = vsyncpa [#allocation6 + $0x1], 0 }
   0x3   :  { %11 = vsyncpa [#allocation4], 0 }
   0x4   :  { %13 = vsyncpa [#allocation4 + $0x1], 0  ;;  %s590_s9 = smov 0   ;;  %s592_s10 = smov 0  }
   0x5   :  { %s594_s11 = smov 0   ;;  %s596_s12 = smov 0  }
   0x6 LB: > { %s611_s13 = sadd.s32 4294967295, %s566_s12   ;;  %s364_s14 = sadd.s32 4294967294, %s566_s12   ;;  %s566_s12 = sphi %s596_s12, %s783_s12   ;;  %s562_s11 = sphi %s594_s11, %s782_s11   ;;  %s558_s10 = sphi %s592_s10, %s781_s10   ;;  %s554_s9 = sphi %s590_s9, %s780_s9  }
   0x7   : > { %s615_s15 = sadd.s32 1, %s566_s12   ;;  %s47_s16 = sadd.s32 1, %s562_s11 }
   0x8   : > { %s44_s17 = ssub.s32 %s566_s12, %s615_s15  ;;  %p54_p0 = scmp.ne.s32.totalorder %s562_s11, %s558_s10 }
   0x9   : > { %p45_p1 = scmp.eq.s32.totalorder %s44_s17, 0  ;;  %p55_p2 = scmp.eq.s32.totalorder %s566_s12, 0 }
   0xa   : > { %p60_p3 = scmp.ne.s32.totalorder %s558_s10, %s554_s9  ;;  %p761_p4 = scmp.eq.s32.totalorder %s611_s13, 0 }
   0xb   : > { %s627_s18 = scalar_select %p45_p1, %s562_s11, %s47_s16  }
   0xc   : > { %p629_p5 = por %p55_p2, %p54_p0  ;;  %p635_p6 = por %p761_p4, %p60_p3 }
   0xd   : > { %p84_p7 = scmp.eq.s32.totalorder %s611_s13, 1  ;;  %p90_p8 = scmp.eq.s32.totalorder %s364_s14, 1 }
   0xe   : > { %s766_s20 = scalar_select %p635_p6, 1, 0 }
   0xf   : > { %p365_p9 = scmp.ge.s32.totalorder %s566_s12, 1  ;;  %p97_p10 = scmp.lt.s32.totalorder %s566_s12, 3 }
  0x10   : > { %p642_p11 = por %p84_p7, %p54_p0  ;;  %p646_p12 = por %p90_p8, %p60_p3 }
  0x11   : > { %p650_p13 = pnand %p365_p9, %p97_p10  ;;  %s568_s24 = smov [#allocation2]  }
  0x12   : > { %s767_s21 = scalar_select %p642_p11, 1, 0 }
  0x13   : > { %s768_s22 = scalar_select %p646_p12, 1, 0 }
  0x14   : > { %s769_s23 = scalar_select %p650_p13, 1, 0 }
  0x15   : > { %p391_p2 = pneg %p650_p13  ;;  %s110_s25 = sshll.u32 %s568_s24, 4  ;;  %s111_s25 = int_to_ptr.vmem [resolvable:$true] %s110_s25 }
  0x16   : > { %p404_p4 = scmp.lt.s32.totalorder %s566_s12, 2  ;;  %p770_p0 = scmp.eq.s32.totalorder %s611_s13, 0 }
  0x17   : > { %s121_s27 = sand.u32 1, %s562_s11   ;;  %s455_s30 = scalar_lea.vmem %s111_s25, 128 }
  0x18   : > { %p660_p7 = pnand %p391_p2, %p770_p0  ;;  %p667_p3 = pnand %p404_p4, %p629_p5 }
  0x19   : > { %s381_s29 = smul.u32 80, %s121_s27  ;;  %p456_p9 = scmp.ne.s32.totalorder %s111_s25, %s455_s30 }
  0x1a   : > { %p446_p8 = pneg %p660_p7  ;;  %p463_p12 = scmp.lt.s32.totalorder %s111_s25, %s111_s25 }
  0x1b   : > { %p464_p11 = scmp.lt.s32.totalorder %s455_s30, %s455_s30 }
  0x1c   : > { %p458_p10 = pnand %p456_p9, %p446_p8 }
  0x1d   : > { %p465_p2 = por %p464_p11, %p463_p12 }
  0x1e   : > { %p459_p1 = pneg %p458_p10 }
  0x20   : > { %p466_p0 = pnand %p465_p2, %p459_p1 }
  0x22   : > { %469 = shalt.err (!%p466_p0)
}
  0x23   : > { %394 = dma.hbm_to_vmem [thread:$0]  (!%p660_p7), %s758_s0, 128, %s111_s25, [#allocation3]  }
  0x24   : > { %s379_s5 = sshll.u32 %s566_s12, 8  ;;  %s125_s6 = scalar_lea.vmem [#allocation5], %s381_s29 }
  0x25   : > { %s132_s7 = sshll.u32 %s125_s6, 4  ;;  %s682_s16 = scalar_lea.hbm %s759_s1, %s379_s5  ;;  %s684_s7 = int_to_ptr.vmem [resolvable:$true] %s132_s7 }
  0x26   : > { %s686_s17 = scalar_lea.sflag [#allocation6], %s121_s27  ;;  %s470_s19 = scalar_lea.hbm %s682_s16, 1280 }
  0x27   : > { %p471_p4 = scmp.ne.s32.totalorder %s682_s16, %s470_s19  ;;  %p472_p5 = pneg %p667_p3 }
  0x28   : > { %s475_s26 = scalar_lea.hbm %s759_s1, 2560  ;;  %p476_p1 = scmp.lt.s32.totalorder %s682_s16, %s759_s1 }
  0x29   : > { %p473_p11 = pnand %p472_p5, %p471_p4  ;;  %p477_p7 = scmp.lt.s32.totalorder %s475_s26, %s470_s19 }
  0x2b   : > { %p474_p12 = pneg %p473_p11  ;;  %p478_p8 = por %p477_p7, %p476_p1 }
  0x2d   : > { %p479_p9 = pnand %p478_p8, %p474_p12 }
  0x2f   : > { %482 = shalt.err (!%p479_p9)
}
  0x30   : > { %s483_s27 = scalar_lea.vmem %s684_s7, 1280  ;;  %s569_s3 = smov [#allocation5]  }
  0x31   : > { %p484_p10 = scmp.ne.s32.totalorder %s684_s7, %s483_s27  ;;  %s488_s4 = sshll.u32 %s569_s3, 4  ;;  %s489_s4 = int_to_ptr.vmem [resolvable:$false] %s488_s4 }
  0x32   : > { %s490_s5 = scalar_lea.vmem %s489_s4, 2560  ;;  %p491_p4 = scmp.lt.s32.totalorder %s684_s7, %s489_s4 }
  0x33   : > { %p486_p2 = pnand %p484_p10, %p472_p5  ;;  %p492_p11 = scmp.lt.s32.totalorder %s490_s5, %s483_s27 }
  0x35   : > { %p487_p0 = pneg %p486_p2  ;;  %p493_p6 = por %p492_p11, %p491_p4 }
  0x37   : > { %p494_p13 = pnand %p493_p6, %p487_p0 }
  0x39   : > { %497 = shalt.err (!%p494_p13)
}
  0x3a   : > { %s570_s6 = smov 512   ;;  %s571_s8 = smov 256  }
  0x3b   : > { %s572_s14 = smov 16   ;;  %p773_p5 = scmp.ne.s32.totalorder %s769_s23, 0 }
  0x3c   : > { %398 = dma.hbm_to_vmem [thread:$0]  (!%p667_p3), %s682_s16, 1280, %s684_s7, %s686_s17, %s570_s6, %s571_s8, %s572_s14  }
  0x3d   : > { %144 = sbr.rel (%p773_p5) target bundleno = 293 (0x125), region = 28  ;;  %p774_p12 = scmp.eq.s32.totalorder (!%p773_p5), %s611_s13, 0 }
  0x42   : > { %541 = dma.done.wait (%p774_p12), [#allocation3], 128   ;;  %p775_p1 = pmov %p774_p12 }
  0x43   : > { %s714_s19 = sand.u32 1, %s558_s10   ;;  %p776_p6 = scmp.ne.s32.totalorder %s766_s20, 0 }
  0x44   : > { %543 = vsyncadd (%p775_p1), [#allocation3], 4294967168  ;;  %s382_s24 = smul.u32 80, %s714_s19  ;;  %s151_s25 = scalar_lea.sflag [#allocation6], %s714_s19 }
  0x46   : > { %s154_s26 = scalar_lea.vmem [#allocation5], %s382_s24 }
  0x47   : > { %545 = dma.done.wait (%p776_p6), %s151_s25, 1280  }
  0x48   : > { %547 = vsyncadd (%p776_p6), %s151_s25, 4294966016  ;;  %v573_v0 = vmov 0.0   ;;  %v187_v1 = vld [vmem:[%s154_s26 + $0x48] sm:$0xff]  ;;  %v186_v2 = vld [vmem:[%s154_s26 + $0x40] sm:$0xff]  ;;  %vm188_vm0 = vcmask 326656   ;;  %s372_s20 = sshll.u32 %s714_s19, 4 }
  0x49   : > { %256 = vmatprep.mubr.f32.mxu0 %v573_v0  ;;  %v185_v3 = vld [vmem:[%s154_s26 + $0x38] sm:$0xff]  ;;  %214 = vmatprep.subr.mxu0 %v187_v1  ;;  %v184_v4 = vld [vmem:[%s154_s26 + $0x30] sm:$0xff]  ;;  %v183_v5 = vld [vmem:[%s154_s26 + $0x28] sm:$0xff]  ;;  %s380_s23 = sshll.u32 %s611_s13, 8  ;;  %s174_s28 = scalar_lea.vmem [#allocation7], %s372_s20 }
  0x4a   : > { %215 = vmatpush1.msra.mxu0 %v186_v2  ;;  %v182_v6 = vld [vmem:[%s154_s26 + $0x20] sm:$0xff]  ;;  %v181_v7 = vld [vmem:[%s154_s26 + $0x18] sm:$0xff]  ;;  %v180_v8 = vld [vmem:[%s154_s26 + $0x10] sm:$0xff]  ;;  %s282_s7 = sshll.u32 %s174_s28, 4  ;;  %s280_s29 = scalar_lea.hbm %s760_s2, %s380_s23  ;;  %s283_s7 = int_to_ptr.vmem [resolvable:$true] %s282_s7 }
  0x4b   : > { %216 = vmatprep.subr.mxu0 %v185_v3  ;;  %v179_v9 = vld [vmem:[%s154_s26 + $0x8] sm:$0xff]  ;;  %v178_v10 = vld [vmem:[%s154_s26] sm:$0xff]  ;;  %s268_s30 = scalar_lea.sflag [#allocation4], %s714_s19  ;;  %s498_s27 = scalar_lea.vmem %s283_s7, 256 }
  0x4c   : > { %217 = vmatpush1.msra.mxu0 %v184_v4  ;;  %v177_v11 = vld [vmem:[#allocation2] sm:$0xff]  ;;  %p499_p13 = scmp.ne.s32.totalorder %s283_s7, %s498_s27  ;;  %p777_p3 = scmp.ne.s32.totalorder %s767_s21, 0 }
  0x4d   : > { %218 = vmatprep.subr.mxu0 %v183_v5  ;;  %s574_s3 = smov [#allocation7]  }
  0x4e   : > { %219 = vmatpush1.msra.mxu0 %v182_v6  ;;  %p500_p7 = pnand %p499_p13, %p777_p3  ;;  %s502_s13 = sshll.u32 %s574_s3, 4  ;;  %s503_s13 = int_to_ptr.vmem [resolvable:$false] %s502_s13 }
  0x4f   : > { %220 = vmatprep.subr.mxu0 %v181_v7  ;;  %s504_s4 = scalar_lea.vmem %s503_s13, 512  ;;  %p505_p9 = scmp.lt.s32.totalorder %s283_s7, %s503_s13 }
  0x50   : > { %221 = vmatpush1.msra.mxu0 %v180_v8  ;;  %p501_p8 = pneg %p500_p7  ;;  %p506_p10 = scmp.lt.s32.totalorder %s504_s4, %s498_s27 }
  0x51   : > { %222 = vmatprep.subr.mxu0 %v179_v9 }
  0x52   : > { %223 = vmatpush1.msra.mxu0 %v178_v10  ;;  %p507_p2 = por %p506_p10, %p505_p9 }
  0x53   : > { %373 = vmatmul.mubr.msk.f32.vlgmr.msra.gmra.mxu0 %vm188_vm0, %v177_v11 }
  0x54   : > { %p508_p0 = pnand %p507_p2, %p501_p8 }
 0x113   : > { %v258_v12 = vpop.f32.mrf.mxu0 }
 0x114   : > { %v263_v13 = vmax.f32 %v258_v12, 0.0 }
 0x115   : > { %v260_v14 = vpop.f32.mrf.mxu0 }
 0x116   : > { %265 = vst [vmem:[%s174_s28] sm:$0xff] %v263_v13  ;;  %v264_v15 = vmax.f32 %v260_v14, 0.0 }
 0x118   : > { %266 = vst [vmem:[%s174_s28 + $0x8] sm:$0xff] %v264_v15 }
 0x119   : > { %511 = shalt.err (!%p508_p0)
}
 0x11a   : > { %s512_s5 = scalar_lea.hbm %s280_s29, 256  ;;  %s516_s14 = scalar_lea.hbm %s760_s2, 512 }
 0x11b   : > { %p513_p4 = scmp.ne.s32.totalorder %s280_s29, %s512_s5  ;;  %p517_p12 = scmp.lt.s32.totalorder %s280_s29, %s760_s2 }
 0x11c   : > { %p518_p1 = scmp.lt.s32.totalorder %s516_s14, %s512_s5 }
 0x11d   : > { %p514_p11 = pnand %p513_p4, %p777_p3 }
 0x11e   : > { %p519_p6 = por %p518_p1, %p517_p12 }
 0x11f   : > { %p515_p5 = pneg %p514_p11 }
 0x121   : > { %p520_p13 = pnand %p519_p6, %p515_p5 }
 0x123   : > { %523 = shalt.err (!%p520_p13)
}
 0x124   : > { %389 = dma.vmem_to_hbm [thread:$0]  (%p777_p3), %s283_s7, 256, %s280_s29, %s268_s30  }
 0x125 PF: > { %s294_s25 = sand.u32 1, %s554_s9   ;;  %p778_p7 = scmp.ne.s32.totalorder %s768_s22, 0 }
 0x126   : > { %p779_p8 = scmp.ge.s32.totalorder %s566_s12, 2  ;;  %s295_s26 = scalar_lea.sflag [#allocation4], %s294_s25 }
 0x128   : > { %p400_p9 = pnand %p779_p8, %p778_p7 }
 0x12a   : > { %p401_p10 = pneg %p400_p9 }
 0x12c   : > { %549 = dma.done.wait (%p401_p10), %s295_s26, 256  }
 0x12d   : > { %551 = vsyncadd (%p401_p10), %s295_s26, 4294967040  ;;  %p16_p2 = scmp.ge.s32.totalorder %s615_s15, 4   ;;  %s780_s9 = smov %s558_s10 }
 0x12e   : > { %s781_s10 = smov %s562_s11  ;;  %s782_s11 = smov %s627_s18 }
 0x12f   : > { %s783_s12 = smov %s615_s15  ;;  %18 = sbr.rel (!%p16_p2) target bundleno = 6 (0x6), region = 78 }
 0x134   :  { %300 = vsyncpa [#allocation3], 1 }
 0x135   :  { %302 = vsyncpa [#allocation3 + $0x1], 1 }
 0x136   :  { %303 = vsyncpa [#allocation6], 1 }
 0x137   :  { %305 = vsyncpa [#allocation6 + $0x1], 1 }
 0x138   :  { %306 = vsyncpa [#allocation4], 1 }
 0x139   :  { %308 = vsyncpa [#allocation4 + $0x1], 1 }

</bundles_post_ra>
